<compile_context>
chip_gen: v7x
topology: tpu7x:2x2x1
jax: 0.10.0
libtpu: 0.0.40
codegen_flags: <defaults>
</compile_context>

<pallas_src>
import functools

import jax
import jax.numpy as jnp
from jax.experimental import pallas as pl
from jax.experimental.pallas import tpu as pltpu

EPS = 1e-6


def rmsnorm_kernel(x_ref, scale_ref, o_ref, *, d_true):
    # x_ref: (tile_rows, D_pad). Compute fully in f32; v5e has no bf16 VALU and
    # on v7x the extra casts would push the VALU slot toward being the limiter.
    xf = x_ref[...].astype(jnp.float32)
    # sum / d_true (not jnp.mean) so a lane-padded D still normalizes by the
    # true feature dimension (padded columns are zeros and contribute nothing).
    ms = jnp.sum(xf * xf, axis=-1, keepdims=True) * (1.0 / d_true)
    norm = jax.lax.rsqrt(ms + EPS)                       # f32, EUP rsqrt
    # scale_ref holds (1 + gain) in f32; broadcast over rows, store once.
    o_ref[...] = (xf * norm * scale_ref[...]).astype(o_ref.dtype)


def _round_up(n, m):
    return ((n + m - 1) // m) * m


def _cdiv(a, b):
    return (a + b - 1) // b


def _choose_tile_rows(n_rows, d_pad, in_itemsize, out_itemsize, row_align,
                      target_block_bytes, vmem_budget_bytes, min_grid_steps):
    # Pipeline bytes per row: double-buffered input + output, plus f32 temps.
    per_row = 2 * d_pad * (in_itemsize + out_itemsize) + 2 * d_pad * 4
    tile = vmem_budget_bytes // max(per_row, 1)
    # Byte-based block target (~2 MiB) — hits ~85%+ of HBM roofline and
    # amortizes the ~0.35 us per-grid-step overhead, regardless of D.
    tile = min(tile, max(target_block_bytes // max(d_pad * in_itemsize, 1),
                         row_align))
    # Keep at least ~min_grid_steps steps so v7x can shard rows over its 2 TCs
    # and the pipeline actually overlaps DMA with compute.
    tile = min(tile, _round_up(_cdiv(n_rows, min_grid_steps), row_align))
    # Don't exceed the data.
    tile = min(tile, _round_up(n_rows, row_align))
    # Align down to the dtype-packed sublane multiple.
    tile = max(row_align, (tile // row_align) * row_align)
    return int(tile)


def rmsnorm(x, gain, *, tile_rows=None, out_dtype=None,
            target_block_bytes=2 * 1024 * 1024,
            vmem_budget_bytes=24 * 1024 * 1024):
    """x: (..., D); gain: (D,). Returns f32 output (torch promotes via f32 gain)."""
    orig_shape = x.shape
    D = int(orig_shape[-1])
    if out_dtype is None:
        out_dtype = jnp.float32   # torch: (x * norm) * (1 + gain_f32) -> f32
    in_itemsize = jnp.dtype(x.dtype).itemsize
    out_itemsize = jnp.dtype(out_dtype).itemsize

    x2 = x.reshape(-1, D)
    N = int(x2.shape[0])

    # Fold the +1.0 into the gain once, in f32 (matches torch parameter math).
    scale = (1.0 + gain.astype(jnp.float32)).reshape(1, D)

    # Lane-density guard: a sub-128 last dim would lower to masked vst.msk
    # partial stores (4-5x slower). Pad to a 128 multiple; slice back at the end.
    D_pad = _round_up(D, 128)
    if D_pad != D:
        x2 = jnp.pad(x2, ((0, 0), (0, D_pad - D)))
        scale = jnp.pad(scale, ((0, 0), (0, D_pad - D)))

    # Sublane packing: 8 rows for 4-byte dtypes, 16 for bf16, 32 for int8/fp8.
    row_align = max(8, 32 // in_itemsize)

    if tile_rows is None:
        tile_rows = _choose_tile_rows(N, D_pad, in_itemsize, out_itemsize,
                                      row_align, target_block_bytes,
                                      vmem_budget_bytes, min_grid_steps=4)

    grid = (_cdiv(N, tile_rows),)

    # Derive the VMEM limit from the real pipeline footprint plus headroom for
    # Mosaic internal scratch/semaphores; cap well below the v7x TC's 64 MiB.
    block_in = tile_rows * D_pad * in_itemsize
    block_out = tile_rows * D_pad * out_itemsize
    pipeline_bytes = 2 * (block_in + block_out) + 2 * D_pad * 4
    vmem_limit = int(min(48 * 1024 * 1024,
                         max(16 * 1024 * 1024, 2 * pipeline_bytes + (8 << 20))))

    kernel = functools.partial(rmsnorm_kernel, d_true=float(D))

    out = pl.pallas_call(
        kernel,
        out_shape=jax.ShapeDtypeStruct((N, D_pad), out_dtype),
        grid_spec=pltpu.PrefetchScalarGridSpec(
            num_scalar_prefetch=0,
            grid=grid,
            in_specs=[
                pl.BlockSpec((tile_rows, D_pad), lambda i: (i, 0)),
                # Constant block index -> fetched once, reused across steps.
                pl.BlockSpec((1, D_pad), lambda i: (0, 0)),
            ],
            out_specs=pl.BlockSpec((tile_rows, D_pad), lambda i: (i, 0)),
        ),
        compiler_params=pltpu.CompilerParams(
            dimension_semantics=("parallel",),   # v7x shards rows over 2 TCs
            vmem_limit_bytes=vmem_limit,
        ),
        cost_estimate=pl.CostEstimate(
            flops=int(5 * N * D_pad),
            transcendentals=int(N),
            bytes_accessed=int(N * D_pad * (in_itemsize + out_itemsize)
                               + grid[0] * D_pad * 4),
        ),
    )(x2, scale)

    if D_pad != D:
        out = out[:, :D]
    return out.reshape(orig_shape)


def rmsnorm_ref(x, gain):
    # Mirrors the torch module exactly: f32 reduction, norm cast to x.dtype,
    # x*norm in x.dtype, then f32 (1 + gain) promotes the result to f32.
    xf = x.astype(jnp.float32)
    rms = jnp.mean(xf * xf, axis=-1, keepdims=True)
    norm = jax.lax.rsqrt(rms + EPS).astype(x.dtype)
    return (x * norm).astype(jnp.float32) * (1.0 + gain.astype(jnp.float32))


if __name__ == "__main__":
    key = jax.random.PRNGKey(0)
    kx, kg = jax.random.split(key)

    B, T, H, D = 2, 8, 4, 128
    gain = jax.random.normal(kg, (D,), dtype=jnp.float32) * 0.02  # randn(dim)*0.02

    # f32 path, auto-sized tile (grid forced to ~4 steps for 2-TC sharding).
    x = jax.random.normal(kx, (B, T, H, D), dtype=jnp.float32)
    out = rmsnorm(x, gain)
    jax.block_until_ready(out)
    ref = rmsnorm_ref(x, gain)
    assert out.shape == (B, T, H, D)
    assert out.dtype == jnp.float32
    assert jnp.allclose(out, ref, atol=1e-5, rtol=1e-5)

    # Ragged grid: tile_rows=48 does not divide N=64 rows -> cdiv grid, no host pad.
    out_ragged = rmsnorm(x, gain, tile_rows=48)
    jax.block_until_ready(out_ragged)
    assert jnp.allclose(out_ragged, ref, atol=1e-5, rtol=1e-5)

    # bf16 input: all-f32 compute path, f32 output (matches torch's gain promotion).
    xb = x.astype(jnp.bfloat16)
    outb = rmsnorm(xb, gain)
    jax.block_until_ready(outb)
    refb = rmsnorm_ref(xb, gain)
    assert outb.dtype == jnp.float32
    assert jnp.allclose(outb, refb, atol=2e-2, rtol=2e-2)

    # Non-128-multiple D: wrapper pads to a lane-dense 128 multiple, slices back.
    D2 = 96
    gain2 = jax.random.normal(kg, (D2,), dtype=jnp.float32) * 0.02
    x3 = jax.random.normal(kx, (B, T, H, D2), dtype=jnp.float32)
    out3 = rmsnorm(x3, gain2)
    jax.block_until_ready(out3)
    ref3 = rmsnorm_ref(x3, gain2)
    assert out3.shape == (B, T, H, D2)
    assert jnp.allclose(out3, ref3, atol=1e-5, rtol=1e-5)

    print("KERNEL_OK")
</pallas_src>

<mosaic_0001>
module attributes {stable_mosaic.version = 11 : i64} {
  func.func @rmsnorm_kernel(%arg0: i32, %arg1: memref<16x128xf32, #tpu.memory_space<vmem>>, %arg2: memref<1x128xf32, #tpu.memory_space<vmem>>, %arg3: memref<16x128xf32, #tpu.memory_space<vmem>>) attributes {dimension_semantics = [#tpu.dimension_semantics<parallel>], iteration_bounds = array<i64: 4>, scalar_prefetch = 0 : i64, scratch_operands = 0 : i64, tpu.core_type = #tpu.core_type<tc>, window_params = [{transform_indices = @transform_0, window_bounds = array<i64: 16, 128>}, {pipeline_mode = #tpu.pipeline_mode<synchronous>, transform_indices = @transform_1, window_bounds = array<i64: 1, 128>}, {transform_indices = @transform_2, window_bounds = array<i64: 16, 128>}]} {
    %c0 = arith.constant 0 : index
    %c0_0 = arith.constant 0 : index
    %0 = vector.load %arg1[%c0, %c0_0] : memref<16x128xf32, #tpu.memory_space<vmem>>, vector<16x128xf32>
    %1 = arith.mulf %0, %0 : vector<16x128xf32>
    %cst = arith.constant dense<0.000000e+00> : vector<16xf32>
    %2 = vector.multi_reduction <add>, %1, %cst [1] : vector<16x128xf32> to vector<16xf32>
    %3 = vector.shape_cast %2 : vector<16xf32> to vector<16x1xf32>
    %cst_1 = arith.constant 7.812500e-03 : f32
    %4 = vector.broadcast %cst_1 : f32 to vector<16x1xf32>
    %5 = arith.mulf %3, %4 : vector<16x1xf32>
    %cst_2 = arith.constant 9.99999997E-7 : f32
    %6 = vector.broadcast %cst_2 : f32 to vector<16x1xf32>
    %7 = arith.addf %5, %6 : vector<16x1xf32>
    %8 = math.rsqrt %7 : vector<16x1xf32>
    %9 = vector.broadcast %8 : vector<16x1xf32> to vector<16x128xf32>
    %10 = arith.mulf %0, %9 : vector<16x128xf32>
    %c0_3 = arith.constant 0 : index
    %c0_4 = arith.constant 0 : index
    %11 = vector.load %arg2[%c0_3, %c0_4] : memref<1x128xf32, #tpu.memory_space<vmem>>, vector<1x128xf32>
    %12 = vector.broadcast %11 : vector<1x128xf32> to vector<16x128xf32>
    %13 = arith.mulf %10, %12 : vector<16x128xf32>
    %c0_5 = arith.constant 0 : index
    %c0_6 = arith.constant 0 : index
    %14 = vector.load %arg3[%c0_5, %c0_6] : memref<16x128xf32, #tpu.memory_space<vmem>>, vector<16x128xf32>
    tpu.vector_store %arg3[%c0_5, %c0_6], %13 {strides = array<i32>} : memref<16x128xf32, #tpu.memory_space<vmem>>, vector<16x128xf32>,
    return
  }
  func.func @transform_0(%arg0: i32) -> (i32, i32) {
    %c0_i32 = arith.constant 0 : i32
    %c0_i32_0 = arith.constant 0 : i32
    return %arg0, %c0_i32 : i32, i32
  }
  func.func @transform_1(%arg0: i32) -> (i32, i32) {
    %c0_i32 = arith.constant 0 : i32
    %c0_i32_0 = arith.constant 0 : i32
    %c0_i32_1 = arith.constant 0 : i32
    return %c0_i32, %c0_i32_0 : i32, i32
  }
  func.func @transform_2(%arg0: i32) -> (i32, i32) {
    %c0_i32 = arith.constant 0 : i32
    %c0_i32_0 = arith.constant 0 : i32
    return %arg0, %c0_i32 : i32, i32
  }
}

</mosaic_0001>

<bundles_post_ra>
// kernel: tpu_custom_call.1
= control target key start
LH: loop header
LB: loop body
LE: loop exit
PB: predicated region body
PF: predicated region fallthrough
CT: control target
= control target key end

     0   :  { %7 = vsyncpa [#allocation3], 0  ;;  %s631_s0 = inlined_call_operand.hbm [shape: f32[64,128], index: 0, kind: input, shape index: {}]   ;;  %s632_s1 = inlined_call_operand.vmem [shape: f32[1,128], index: 1, kind: input, shape index: {}]   ;;  %s633_s2 = inlined_call_operand.hbm [shape: f32[64,128], index: 2, kind: output, shape index: {}]  }
   0x1   :  { %9 = vsyncpa [#allocation3 + $0x1], 0 }
   0x2   :  { %10 = vsyncpa [#allocation4], 0 }
   0x3   :  { %12 = vsyncpa [#allocation4 + $0x1], 0  ;;  %s468_s9 = smov 0   ;;  %s470_s10 = smov 0  }
   0x4   :  { %s472_s11 = smov 0   ;;  %s474_s12 = smov 0  }
   0x5 LB: > { %s489_s13 = sadd.s32 4294967295, %s445_s12   ;;  %s278_s14 = sadd.s32 4294967294, %s445_s12   ;;  %s445_s12 = sphi %s474_s12, %s645_s12   ;;  %s441_s11 = sphi %s472_s11, %s644_s11   ;;  %s437_s10 = sphi %s470_s10, %s643_s10   ;;  %s433_s9 = sphi %s468_s9, %s642_s9  }
   0x6   : > { %s493_s15 = sadd.s32 1, %s445_s12   ;;  %s25_s16 = sadd.s32 1, %s441_s11 }
   0x7   : > { %s22_s17 = ssub.s32 %s445_s12, %s493_s15  ;;  %p32_p0 = scmp.ne.s32.totalorder %s441_s11, %s437_s10 }
   0x8   : > { %p23_p1 = scmp.eq.s32.totalorder %s22_s17, 0  ;;  %p33_p2 = scmp.eq.s32.totalorder %s445_s12, 0 }
   0x9   : > { %p38_p3 = scmp.ne.s32.totalorder %s437_s10, %s433_s9  ;;  %p39_p4 = scmp.eq.s32.totalorder %s489_s13, 0 }
   0xa   : > { %s505_s18 = scalar_select %p23_p1, %s441_s11, %s25_s16  }
   0xb   : > { %p507_p5 = por %p33_p2, %p32_p0  ;;  %p511_p6 = por %p39_p4, %p38_p3 }
   0xc   : > { %p83_p7 = scmp.eq.s32.totalorder %s489_s13, 3  ;;  %p89_p8 = scmp.eq.s32.totalorder %s278_s14, 3 }
   0xd   : > { %p307_p9 = scmp.lt.s32.totalorder %s445_s12, 4  ;;  %s112_s23 = sand.u32 1, %s441_s11  }
   0xe   : > { %p517_p10 = por %p83_p7, %p32_p0  ;;  %p521_p11 = por %p89_p8, %p38_p3 }
   0xf   : > { %s293_s24 = sshll.u32 %s445_s12, 8  ;;  %s281_s25 = sshll.u32 %s112_s23, 4 }
  0x10   : > { %s637_s21 = scalar_select %p517_p10, 1, 0 }
  0x11   : > { %s638_s22 = scalar_select %p521_p11, 1, 0 }
  0x12   : > { %s530_s28 = scalar_lea.hbm %s631_s0, %s293_s24  ;;  %s116_s29 = scalar_lea.vmem [#allocation2], %s281_s25 }
  0x13   : > { %s123_s30 = sshll.u32 %s116_s29, 4  ;;  %p534_p12 = pnand %p307_p9, %p507_p5  ;;  %s538_s30 = int_to_ptr.vmem [resolvable:$true] %s123_s30 }
  0x14   : > { %s540_s4 = scalar_lea.sflag [#allocation3], %s112_s23  ;;  %s349_s5 = scalar_lea.hbm %s530_s28, 256 }
  0x15   : > { %p350_p13 = scmp.ne.s32.totalorder %s530_s28, %s349_s5  ;;  %p351_p0 = pneg %p534_p12 }
  0x16   : > { %s354_s8 = scalar_lea.hbm %s631_s0, 1024  ;;  %p355_p3 = scmp.lt.u32.totalorder %s530_s28, %s631_s0 }
  0x17   : > { %p352_p1 = pnand %p351_p0, %p350_p13  ;;  %p356_p4 = scmp.lt.u32.totalorder %s354_s8, %s349_s5 }
  0x18   : > { %p358_p7 = scmp.lt.u32.totalorder %s349_s5, %s530_s28 }
  0x19   : > { %p353_p2 = pneg %p352_p1  ;;  %p357_p5 = por %p356_p4, %p355_p3 }
  0x1b   : > { %p359_p8 = por %p358_p7, %p357_p5 }
  0x1d   : > { %p360_p9 = pnand %p359_p8, %p353_p2 }
  0x1f   : > { %363 = shalt.err (!%p360_p9)
}
  0x20   : > { %s364_s17 = scalar_lea.vmem %s538_s30, 256  ;;  %s447_s19 = smov [#allocation2]  }
  0x21   : > { %p365_p13 = scmp.ne.s32.totalorder %s538_s30, %s364_s17  ;;  %s369_s23 = sshll.u32 %s447_s19, 4  ;;  %s370_s23 = int_to_ptr.vmem [resolvable:$false] %s369_s23 }
  0x22   : > { %s371_s24 = scalar_lea.vmem %s370_s23, 512  ;;  %p372_p10 = scmp.lt.s32.totalorder %s538_s30, %s370_s23 }
  0x23   : > { %p367_p1 = pnand %p365_p13, %p351_p0  ;;  %p373_p3 = scmp.lt.s32.totalorder %s371_s24, %s364_s17 }
  0x25   : > { %p368_p11 = pneg %p367_p1  ;;  %p374_p4 = por %p373_p3, %p372_p10 }
  0x27   : > { %p375_p5 = pnand %p374_p4, %p368_p11 }
  0x29   : > { %378 = shalt.err (!%p375_p5)
}
  0x2a   : > { %s448_s25 = smov 128   ;;  %s449_s26 = smov 8  }
  0x2b   : > { %302 = dma.hbm_to_vmem [thread:$0]  (!%p534_p12), %s530_s28, 256, %s538_s30, %s540_s4, %s448_s25, %s448_s25, %s449_s26  }
  0x2c   : > { %p284_p0 = scmp.ge.s32.totalorder %s445_s12, 1  ;;  %p131_p2 = scmp.lt.s32.totalorder %s445_s12, 5 }
  0x2e   : > { %p132_p7 = pnand %p284_p0, %p131_p2 }
  0x2f   : > { %s571_s27 = sand.u32 (!%p132_p7), 1, %s437_s10  }
  0x30   : > { %135 = sbr.rel (%p132_p7) target bundleno = 239 (0xef), region = 28  ;;  %s285_s29 = sshll.u32 (!%p132_p7), %s571_s27, 4 }
  0x31   : > { %s138_s5 = scalar_lea.sflag (!%p132_p7), [#allocation3], %s571_s27  ;;  %s141_s6 = scalar_lea.vmem (!%p132_p7), [#allocation2], %s285_s29 }
  0x37   : > { %424 = dma.done.wait (%p511_p6), %s138_s5, 256  }
  0x38   : > { %426 = vsyncadd (%p511_p6), %s138_s5, 4294967040  ;;  %v164_v0 = vld [vmem:[%s141_s6] sm:$0xff]  ;;  %v165_v1 = vld [vmem:[%s141_s6 + $0x8] sm:$0xff]  ;;  %s294_s30 = sshll.u32 %s489_s13, 8  ;;  %s161_s3 = scalar_lea.vmem [#allocation5], %s285_s29 }
  0x39   : > { %v166_v2 = vmul.f32 %v164_v0, %v164_v0  ;;  %v167_v3 = vmul.f32 %v165_v1, %v165_v1  ;;  %v287_v11 = vld [vmem:[%s632_s1] ss:$0 sm:$0xff]  ;;  %s205_s4 = sshll.u32 %s161_s3, 4  ;;  %s586_s14 = scalar_lea.hbm %s633_s2, %s294_s30  ;;  %s588_s4 = int_to_ptr.vmem [resolvable:$true] %s205_s4 }
  0x3a   : > { %s192_s16 = scalar_lea.sflag [#allocation4], %s571_s27  ;;  %s379_s17 = scalar_lea.vmem %s588_s4, 256 }
  0x3b   : > { %168 = vadd.xlane.f32.xlu0 %v166_v2  ;;  %p380_p6 = scmp.ne.s32.totalorder %s588_s4, %s379_s17  ;;  %p640_p10 = scmp.ne.s32.totalorder %s637_s21, 0 }
  0x3c   : > { %s450_s13 = smov [#allocation5]  }
  0x3d   : > { %p381_p11 = pnand %p380_p6, %p640_p10  ;;  %s383_s19 = sshll.u32 %s450_s13, 4  ;;  %s384_s19 = int_to_ptr.vmem [resolvable:$false] %s383_s19 }
  0x3e   : > { %s385_s23 = scalar_lea.vmem %s384_s19, 512  ;;  %p386_p8 = scmp.lt.s32.totalorder %s588_s4, %s384_s19 }
  0x3f   : > { %170 = vadd.xlane.f32.xlu0 %v167_v3  ;;  %p382_p12 = pneg %p381_p11  ;;  %p387_p9 = scmp.lt.s32.totalorder %s385_s23, %s379_s17 }
  0x41   : > { %p388_p13 = por %p387_p9, %p386_p8 }
  0x43   : > { %p389_p1 = pnand %p388_p13, %p382_p12 }
  0xc8   : > { %v169_v4 = vpop.xlane.xlu0 %168 }
  0xc9   : > { %v172_v5 = vmul.f32 0.0078125, %v169_v4 }
  0xcb   : > { %v174_v6 = vadd.f32 1e-06, %v172_v5 }
  0xcc   : > { %v171_v7 = vpop.xlane.xlu0 %170 }
  0xcd   : > { %345 = vrsqrt.f32 %v174_v6  ;;  %v173_v8 = vmul.f32 0.0078125, %v171_v7 }
  0xcf   : > { %v175_v9 = vadd.f32 1e-06, %v173_v8 }
  0xd1   : > { %347 = vrsqrt.f32 %v175_v9 }
  0xd7   : > { %v346_v10 = vpop.eup %345 }
  0xd8   : > { %v178_v12 = vmul.f32 %v346_v10, %v164_v0 }
  0xda   : > { %v187_v13 = vmul.f32 %v287_v11, %v178_v12 }
  0xdb   : > { %v348_v14 = vpop.eup %347 }
  0xdc   : > { %v179_v15 = vmul.f32 %v348_v14, %v165_v1  ;;  %189 = vst [vmem:[%s161_s3] sm:$0xff] %v187_v13 }
  0xde   : > { %v188_v16 = vmul.f32 %v287_v11, %v179_v15 }
  0xe0   : > { %190 = vst [vmem:[%s161_s3 + $0x8] sm:$0xff] %v188_v16 }
  0xe1   : > { %392 = shalt.err (!%p389_p1)
}
  0xe2   : > { %s393_s24 = scalar_lea.hbm %s586_s14, 256  ;;  %s397_s29 = scalar_lea.hbm %s633_s2, 1024 }
  0xe3   : > { %p394_p3 = scmp.ne.s32.totalorder %s586_s14, %s393_s24  ;;  %p398_p0 = scmp.lt.u32.totalorder %s586_s14, %s633_s2 }
  0xe4   : > { %p399_p2 = scmp.lt.u32.totalorder %s397_s29, %s393_s24  ;;  %p401_p6 = scmp.lt.u32.totalorder %s393_s24, %s586_s14 }
  0xe5   : > { %p395_p4 = pnand %p394_p3, %p640_p10 }
  0xe6   : > { %p400_p7 = por %p399_p2, %p398_p0 }
  0xe7   : > { %p396_p5 = pneg %p395_p4 }
  0xe8   : > { %p402_p11 = por %p401_p6, %p400_p7 }
  0xea   : > { %p403_p12 = pnand %p402_p11, %p396_p5 }
  0xec   : > { %406 = shalt.err (!%p403_p12)
}
  0xed   : > { %s451_s28 = smov 128   ;;  %s452_s20 = smov 8  }
  0xee   : > { %297 = dma.vmem_to_hbm [thread:$0]  (%p640_p10), %s588_s4, 256, %s586_s14, %s192_s16, %s451_s28, %s451_s28, %s452_s20  }
  0xef PF: > { %p308_p8 = scmp.ge.s32.totalorder %s445_s12, 2  ;;  %s220_s30 = sand.u32 1, %s433_s9  }
  0xf0   : > { %p641_p9 = scmp.ne.s32.totalorder %s638_s22, 0  ;;  %s221_s3 = scalar_lea.sflag [#allocation4], %s220_s30 }
  0xf2   : > { %p304_p13 = pnand %p308_p8, %p641_p9 }
  0xf4   : > { %428 = dma.done.wait (!%p304_p13), %s221_s3, 256  }
  0xf5   : > { %430 = vsyncadd (!%p304_p13), %s221_s3, 4294967040  ;;  %p15_p1 = scmp.ge.s32.totalorder %s493_s15, 6   ;;  %s642_s9 = smov %s437_s10 }
  0xf6   : > { %s643_s10 = smov %s441_s11  ;;  %s644_s11 = smov %s505_s18 }
  0xf7   : > { %s645_s12 = smov %s493_s15  ;;  %17 = sbr.rel (!%p15_p1) target bundleno = 5 (0x5), region = 73 }
  0xfe   :  { %226 = vsyncpa [#allocation3], 1 }
  0xff   :  { %228 = vsyncpa [#allocation3 + $0x1], 1 }
 0x100   :  { %229 = vsyncpa [#allocation4], 1 }
 0x101   :  { %231 = vsyncpa [#allocation4 + $0x1], 1 }

</bundles_post_ra>
